<compile_context>
chip_gen: v6e
topology: v6e:2x2x1
jax: 0.10.0
libtpu: 0.0.40
codegen_flags: <defaults>
</compile_context>

<pallas_src>
import jax
import jax.numpy as jnp
from jax.experimental import pallas as pl
from jax.experimental.pallas import tpu as pltpu

LN_EPS = 1e-5  # nn.LayerNorm default


def _layernorm_store(y, gamma_ref, beta_ref, o_ref):
    """LayerNorm over the last (lane) axis, computed in f32, then store."""
    mean = jnp.mean(y, axis=-1, keepdims=True)
    centered = y - mean
    var = jnp.mean(centered * centered, axis=-1, keepdims=True)
    inv = jax.lax.rsqrt(var + LN_EPS)                      # EUP slot, cheap
    o_ref[...] = (centered * inv * gamma_ref[...] + beta_ref[...]).astype(o_ref.dtype)


def _fused_kernel(x_ref, wcat_ref, bcat_ref, w2_ref, b2_ref,
                  gamma_ref, beta_ref, o_ref):
    """Fused (shortcut | linear1) path; requires Fout % 128 == 0."""
    fout = o_ref.shape[-1]
    x = x_ref[...]                                          # (TB, Fin) bf16
    # One MXU pass reads x once, produces lane-dense (TB, 2*Fout) in f32.
    z = jnp.dot(x, wcat_ref[...], preferred_element_type=jnp.float32) + bcat_ref[...]
    res = z[:, :fout]                                       # shortcut (vreg-aligned split)
    h = jnp.maximum(z[:, fout:], 0.0).astype(jnp.bfloat16)  # linear1 + ReLU
    out = jnp.dot(h, w2_ref[...], preferred_element_type=jnp.float32) + b2_ref[...]
    # TODO(synk): dropout(p=0.5) is identity (eval-mode semantics); training
    # mode would use pltpu.prng_seed + pltpu.prng_random_bits with 1/(1-p).
    _layernorm_store(out + res, gamma_ref, beta_ref, o_ref)


def _unfused_kernel(x_ref, ws_ref, bs_ref, w1_ref, b1_ref, w2_ref, b2_ref,
                    gamma_ref, beta_ref, o_ref):
    """Fallback for Fout % 128 != 0: separate dots avoid cross-lane-tile slices."""
    x = x_ref[...]                                          # (TB, Fin) bf16
    res = jnp.dot(x, ws_ref[...], preferred_element_type=jnp.float32) + bs_ref[...]
    h = jnp.maximum(
        jnp.dot(x, w1_ref[...], preferred_element_type=jnp.float32) + b1_ref[...],
        0.0).astype(jnp.bfloat16)
    out = jnp.dot(h, w2_ref[...], preferred_element_type=jnp.float32) + b2_ref[...]
    _layernorm_store(out + res, gamma_ref, beta_ref, o_ref)


def residual_block(x, w1, b1, w2, b2, ws, bs, gamma, beta, *, tile_b=None):
    """x: (B, Fin) f32. Weights pre-transposed to (in, out); biases (1, out)."""
    B, Fin = x.shape
    Fout = w1.shape[1]
    fused = (Fout % 128 == 0)   # keep the z split point lane/vreg aligned

    # bf16 MXU operands; accumulation stays f32 via preferred_element_type.
    xb = x.astype(jnp.bfloat16)
    w1b, w2b, wsb = (w.astype(jnp.bfloat16) for w in (w1, w2, ws))
    b1f, b2f, bsf = (b.reshape(1, Fout).astype(jnp.float32) for b in (b1, b2, bs))
    gammaf = gamma.reshape(1, Fout).astype(jnp.float32)
    betaf = beta.reshape(1, Fout).astype(jnp.float32)

    # Batch tiling: single full-array tile for small B (no padding, no
    # per-step grid overhead); otherwise 512/1024-row tiles (multiples of 8)
    # with the ragged last tile handled by Pallas's clipped partial blocks.
    if tile_b is None:
        if B <= 512:
            tile_b = B
        else:
            tile_b = 512
            if 2 * 1024 * (2 * Fin + 4 * Fout) < (8 << 20):
                tile_b = 1024
    tile_b = min(tile_b, B)
    if tile_b < B:
        tile_b = max(8, (tile_b // 8) * 8)
    num_tiles = pl.cdiv(B, tile_b)

    # VMEM budget: cap at 75% of physical VMEM (~48 MiB on v7x, ~96 MiB on
    # v5e/v6e) and leave 2x headroom over the estimated residency.
    try:
        vmem_cap = int(pltpu.get_tpu_info().vmem_capacity_bytes)
    except Exception:
        vmem_cap = 64 << 20   # conservative (v7x-sized) default
    cap = (vmem_cap * 3) // 4

    if fused:
        w_cat = jnp.concatenate([wsb, w1b], axis=1)         # (Fin, 2*Fout) bf16
        b_cat = jnp.concatenate([bsf, b1f], axis=1)         # (1, 2*Fout) f32
        weight_args = (w_cat, b_cat, w2b, b2f, gammaf, betaf)
        kernel = _fused_kernel
    else:
        weight_args = (wsb, bsf, w1b, b1f, w2b, b2f, gammaf, betaf)
        kernel = _unfused_kernel

    weight_bytes = sum(int(a.size) * a.dtype.itemsize for a in weight_args)
    streamed_bytes = 2 * (tile_b * Fin * 2 + tile_b * Fout * 4)  # double-buffered x/out
    # TODO(synk): if weight_bytes ever exceeds ~0.6*VMEM (hits v7x's 64 MiB
    # first), add a K-reduction grid axis over Fin ("arbitrary", f32 acc
    # scratch) instead of keeping the weights fully VMEM-resident.

    def _run(single_buffer_weights):
        wbuf = 1 if single_buffer_weights else 2
        vmem_limit = int(min(cap, max(16 << 20,
                                      2 * (wbuf * weight_bytes + streamed_bytes))))

        def const_spec(shape):
            kwargs = {}
            if single_buffer_weights:
                kwargs["pipeline_mode"] = pl.Buffered(1)    # resident: no double buffer
            return pl.BlockSpec(shape, lambda i, n=len(shape): (0,) * n, **kwargs)

        in_specs = [pl.BlockSpec((tile_b, Fin), lambda i: (i, 0))]     # x (streamed)
        in_specs += [const_spec(a.shape) for a in weight_args]         # resident params

        return pl.pallas_call(
            kernel,
            out_shape=jax.ShapeDtypeStruct((B, Fout), jnp.float32),
            grid=(num_tiles,),
            in_specs=in_specs,
            out_specs=pl.BlockSpec((tile_b, Fout), lambda i: (i, 0)),
            compiler_params=pltpu.CompilerParams(
                dimension_semantics=("parallel",),          # megacore sharding on v7x
                vmem_limit_bytes=vmem_limit,
            ),
        )(xb, *weight_args)

    try:
        return jax.block_until_ready(_run(True))
    except Exception:
        # pipeline_mode=pl.Buffered(1) not supported by this jax version:
        # fall back to default (double-buffered) pipelining for the weights.
        return jax.block_until_ready(_run(False))


def reference(x, w1, b1, w2, b2, ws, bs, gamma, beta):
    res = x @ ws + bs
    h = jnp.maximum(x @ w1 + b1, 0.0)
    out = h @ w2 + b2
    y = out + res
    mean = jnp.mean(y, axis=-1, keepdims=True)
    var = jnp.mean((y - mean) ** 2, axis=-1, keepdims=True)
    return (y - mean) * jax.lax.rsqrt(var + LN_EPS) * gamma + beta


if __name__ == "__main__":
    batch, in_features, out_features = 12, 32, 128

    key = jax.random.PRNGKey(0)
    keys = jax.random.split(key, 8)

    x = jax.random.normal(keys[0], (batch, in_features), dtype=jnp.float32)

    # Deterministic parameter init (PyTorch-Linear-like uniform bounds),
    # weights stored pre-transposed as (in, out).
    def init_linear(kw, kb, fan_in, fan_out):
        bound = 1.0 / jnp.sqrt(fan_in)
        w = jax.random.uniform(kw, (fan_in, fan_out), jnp.float32, -bound, bound)
        b = jax.random.uniform(kb, (1, fan_out), jnp.float32, -bound, bound)
        return w, b

    w1, b1 = init_linear(keys[1], keys[2], in_features, out_features)
    w2, b2 = init_linear(keys[3], keys[4], out_features, out_features)
    ws, bs = init_linear(keys[5], keys[6], in_features, out_features)
    gamma = jnp.ones((1, out_features), jnp.float32)
    beta = jnp.zeros((1, out_features), jnp.float32)

    # Small-batch fast path: one full-array tile, no padding, no out[:B] slice.
    out = residual_block(x, w1, b1, w2, b2, ws, bs, gamma, beta)
    out = jax.block_until_ready(out)

    ref = reference(x, w1, b1, w2, b2, ws, bs, gamma, beta)
    assert out.shape == (batch, out_features)
    # bf16 MXU operands vs f32 reference -> loosened tolerance.
    assert jnp.allclose(out, ref, atol=3e-2, rtol=3e-2), "mismatch vs reference"

    print("KERNEL_OK")
</pallas_src>

<mosaic_0001>
module attributes {stable_mosaic.version = 11 : i64} {
  func.func @_fused_kernel(%arg0: i32, %arg1: memref<12x32xbf16, #tpu.memory_space<vmem>>, %arg2: memref<32x256xbf16, #tpu.memory_space<vmem>>, %arg3: memref<1x256xf32, #tpu.memory_space<vmem>>, %arg4: memref<128x128xbf16, #tpu.memory_space<vmem>>, %arg5: memref<1x128xf32, #tpu.memory_space<vmem>>, %arg6: memref<1x128xf32, #tpu.memory_space<vmem>>, %arg7: memref<1x128xf32, #tpu.memory_space<vmem>>, %arg8: memref<12x128xf32, #tpu.memory_space<vmem>>) attributes {dimension_semantics = [#tpu.dimension_semantics<parallel>], iteration_bounds = array<i64: 1>, scalar_prefetch = 0 : i64, scratch_operands = 0 : i64, tpu.core_type = #tpu.core_type<tc>, window_params = [{transform_indices = @transform_0, window_bounds = array<i64: 12, 32>}, {pipeline_mode = #tpu.pipeline_mode<synchronous>, transform_indices = @transform_1, window_bounds = array<i64: 32, 256>}, {pipeline_mode = #tpu.pipeline_mode<synchronous>, transform_indices = @transform_2, window_bounds = array<i64: 1, 256>}, {pipeline_mode = #tpu.pipeline_mode<synchronous>, transform_indices = @transform_3, window_bounds = array<i64: 128, 128>}, {pipeline_mode = #tpu.pipeline_mode<synchronous>, transform_indices = @transform_4, window_bounds = array<i64: 1, 128>}, {pipeline_mode = #tpu.pipeline_mode<synchronous>, transform_indices = @transform_5, window_bounds = array<i64: 1, 128>}, {pipeline_mode = #tpu.pipeline_mode<synchronous>, transform_indices = @transform_6, window_bounds = array<i64: 1, 128>}, {transform_indices = @transform_7, window_bounds = array<i64: 12, 128>}]} {
    %c0 = arith.constant 0 : index
    %c0_0 = arith.constant 0 : index
    %0 = vector.load %arg1[%c0, %c0_0] : memref<12x32xbf16, #tpu.memory_space<vmem>>, vector<12x32xbf16>
    %c0_1 = arith.constant 0 : index
    %c0_2 = arith.constant 0 : index
    %1 = vector.load %arg2[%c0_1, %c0_2] : memref<32x256xbf16, #tpu.memory_space<vmem>>, vector<32x256xbf16>
    %cst = arith.constant dense<0.000000e+00> : vector<12x256xf32>
    %2 = tpu.matmul %0, %1, %cst {dimension_numbers = #tpu.dot_dimension_numbers<[1], [0], [0], [1], [0, 0, 1, 1], [], []>} : vector<12x32xbf16>, vector<32x256xbf16>, vector<12x256xf32> -> vector<12x256xf32>
    %c0_3 = arith.constant 0 : index
    %c0_4 = arith.constant 0 : index
    %3 = vector.load %arg3[%c0_3, %c0_4] : memref<1x256xf32, #tpu.memory_space<vmem>>, vector<1x256xf32>
    %4 = vector.broadcast %3 : vector<1x256xf32> to vector<12x256xf32>
    %5 = arith.addf %2, %4 : vector<12x256xf32>
    %6 = vector.extract_strided_slice %5 {offsets = [0, 0], sizes = [12, 128], strides = [1, 1]} : vector<12x256xf32> to vector<12x128xf32>
    %7 = vector.extract_strided_slice %5 {offsets = [0, 128], sizes = [12, 128], strides = [1, 1]} : vector<12x256xf32> to vector<12x128xf32>
    %cst_5 = arith.constant 0.000000e+00 : f32
    %8 = vector.broadcast %cst_5 : f32 to vector<12x128xf32>
    %9 = arith.maximumf %7, %8 : vector<12x128xf32>
    %10 = arith.truncf %9 : vector<12x128xf32> to vector<12x128xbf16>
    %c0_6 = arith.constant 0 : index
    %c0_7 = arith.constant 0 : index
    %11 = vector.load %arg4[%c0_6, %c0_7] : memref<128x128xbf16, #tpu.memory_space<vmem>>, vector<128x128xbf16>
    %cst_8 = arith.constant dense<0.000000e+00> : vector<12x128xf32>
    %12 = tpu.matmul %10, %11, %cst_8 {dimension_numbers = #tpu.dot_dimension_numbers<[1], [0], [0], [1], [0, 0, 1, 1], [], []>} : vector<12x128xbf16>, vector<128x128xbf16>, vector<12x128xf32> -> vector<12x128xf32>
    %c0_9 = arith.constant 0 : index
    %c0_10 = arith.constant 0 : index
    %13 = vector.load %arg5[%c0_9, %c0_10] : memref<1x128xf32, #tpu.memory_space<vmem>>, vector<1x128xf32>
    %14 = vector.broadcast %13 : vector<1x128xf32> to vector<12x128xf32>
    %15 = arith.addf %12, %14 : vector<12x128xf32>
    %16 = arith.addf %15, %6 : vector<12x128xf32>
    %cst_11 = arith.constant dense<0.000000e+00> : vector<12xf32>
    %17 = vector.multi_reduction <add>, %16, %cst_11 [1] : vector<12x128xf32> to vector<12xf32>
    %18 = vector.shape_cast %17 : vector<12xf32> to vector<12x1xf32>
    %cst_12 = arith.constant 1.280000e+02 : f32
    %19 = vector.broadcast %cst_12 : f32 to vector<12x1xf32>
    %20 = arith.divf %18, %19 : vector<12x1xf32>
    %21 = vector.broadcast %20 : vector<12x1xf32> to vector<12x128xf32>
    %22 = arith.subf %16, %21 : vector<12x128xf32>
    %23 = arith.mulf %22, %22 : vector<12x128xf32>
    %cst_13 = arith.constant dense<0.000000e+00> : vector<12xf32>
    %24 = vector.multi_reduction <add>, %23, %cst_13 [1] : vector<12x128xf32> to vector<12xf32>
    %25 = vector.shape_cast %24 : vector<12xf32> to vector<12x1xf32>
    %cst_14 = arith.constant 1.280000e+02 : f32
    %26 = vector.broadcast %cst_14 : f32 to vector<12x1xf32>
    %27 = arith.divf %25, %26 : vector<12x1xf32>
    %cst_15 = arith.constant 9.99999974E-6 : f32
    %28 = vector.broadcast %cst_15 : f32 to vector<12x1xf32>
    %29 = arith.addf %27, %28 : vector<12x1xf32>
    %30 = math.rsqrt %29 : vector<12x1xf32>
    %31 = vector.broadcast %30 : vector<12x1xf32> to vector<12x128xf32>
    %32 = arith.mulf %22, %31 : vector<12x128xf32>
    %c0_16 = arith.constant 0 : index
    %c0_17 = arith.constant 0 : index
    %33 = vector.load %arg6[%c0_16, %c0_17] : memref<1x128xf32, #tpu.memory_space<vmem>>, vector<1x128xf32>
    %34 = vector.broadcast %33 : vector<1x128xf32> to vector<12x128xf32>
    %35 = arith.mulf %32, %34 : vector<12x128xf32>
    %c0_18 = arith.constant 0 : index
    %c0_19 = arith.constant 0 : index
    %36 = vector.load %arg7[%c0_18, %c0_19] : memref<1x128xf32, #tpu.memory_space<vmem>>, vector<1x128xf32>
    %37 = vector.broadcast %36 : vector<1x128xf32> to vector<12x128xf32>
    %38 = arith.addf %35, %37 : vector<12x128xf32>
    %c0_20 = arith.constant 0 : index
    %c0_21 = arith.constant 0 : index
    %39 = vector.load %arg8[%c0_20, %c0_21] : memref<12x128xf32, #tpu.memory_space<vmem>>, vector<12x128xf32>
    tpu.vector_store %arg8[%c0_20, %c0_21], %38 {strides = array<i32>} : memref<12x128xf32, #tpu.memory_space<vmem>>, vector<12x128xf32>,
    return
  }
  func.func @transform_0(%arg0: i32) -> (i32, i32) {
    %c0_i32 = arith.constant 0 : i32
    %c0_i32_0 = arith.constant 0 : i32
    return %arg0, %c0_i32 : i32, i32
  }
  func.func @transform_1(%arg0: i32) -> (i32, i32) {
    %c0_i32 = arith.constant 0 : i32
    %c0_i32_0 = arith.constant 0 : i32
    %c0_i32_1 = arith.constant 0 : i32
    return %c0_i32, %c0_i32_0 : i32, i32
  }
  func.func @transform_2(%arg0: i32) -> (i32, i32) {
    %c0_i32 = arith.constant 0 : i32
    %c0_i32_0 = arith.constant 0 : i32
    %c0_i32_1 = arith.constant 0 : i32
    return %c0_i32, %c0_i32_0 : i32, i32
  }
  func.func @transform_3(%arg0: i32) -> (i32, i32) {
    %c0_i32 = arith.constant 0 : i32
    %c0_i32_0 = arith.constant 0 : i32
    %c0_i32_1 = arith.constant 0 : i32
    return %c0_i32, %c0_i32_0 : i32, i32
  }
  func.func @transform_4(%arg0: i32) -> (i32, i32) {
    %c0_i32 = arith.constant 0 : i32
    %c0_i32_0 = arith.constant 0 : i32
    %c0_i32_1 = arith.constant 0 : i32
    return %c0_i32, %c0_i32_0 : i32, i32
  }
  func.func @transform_5(%arg0: i32) -> (i32, i32) {
    %c0_i32 = arith.constant 0 : i32
    %c0_i32_0 = arith.constant 0 : i32
    %c0_i32_1 = arith.constant 0 : i32
    return %c0_i32, %c0_i32_0 : i32, i32
  }
  func.func @transform_6(%arg0: i32) -> (i32, i32) {
    %c0_i32 = arith.constant 0 : i32
    %c0_i32_0 = arith.constant 0 : i32
    %c0_i32_1 = arith.constant 0 : i32
    return %c0_i32, %c0_i32_0 : i32, i32
  }
  func.func @transform_7(%arg0: i32) -> (i32, i32) {
    %c0_i32 = arith.constant 0 : i32
    %c0_i32_0 = arith.constant 0 : i32
    return %arg0, %c0_i32 : i32, i32
  }
}

module attributes {stable_mosaic.version = 11 : i64} {
  func.func @_fused_kernel(%arg0: i32, %arg1: memref<12x32xbf16, #tpu.memory_space<vmem>>, %arg2: memref<32x256xbf16, #tpu.memory_space<vmem>>, %arg3: memref<1x256xf32, #tpu.memory_space<vmem>>, %arg4: memref<128x128xbf16, #tpu.memory_space<vmem>>, %arg5: memref<1x128xf32, #tpu.memory_space<vmem>>, %arg6: memref<1x128xf32, #tpu.memory_space<vmem>>, %arg7: memref<1x128xf32, #tpu.memory_space<vmem>>, %arg8: memref<12x128xf32, #tpu.memory_space<vmem>>) attributes {dimension_semantics = [#tpu.dimension_semantics<parallel>], iteration_bounds = array<i64: 1>, scalar_prefetch = 0 : i64, scratch_operands = 0 : i64, tpu.core_type = #tpu.core_type<tc>, window_params = [{transform_indices = @transform_0, window_bounds = array<i64: 12, 32>}, {pipeline_mode = #tpu.pipeline_mode<synchronous>, transform_indices = @transform_1, window_bounds = array<i64: 32, 256>}, {pipeline_mode = #tpu.pipeline_mode<synchronous>, transform_indices = @transform_2, window_bounds = array<i64: 1, 256>}, {pipeline_mode = #tpu.pipeline_mode<synchronous>, transform_indices = @transform_3, window_bounds = array<i64: 128, 128>}, {pipeline_mode = #tpu.pipeline_mode<synchronous>, transform_indices = @transform_4, window_bounds = array<i64: 1, 128>}, {pipeline_mode = #tpu.pipeline_mode<synchronous>, transform_indices = @transform_5, window_bounds = array<i64: 1, 128>}, {pipeline_mode = #tpu.pipeline_mode<synchronous>, transform_indices = @transform_6, window_bounds = array<i64: 1, 128>}, {transform_indices = @transform_7, window_bounds = array<i64: 12, 128>}]} {
    %c0 = arith.constant 0 : index
    %c0_0 = arith.constant 0 : index
    %0 = vector.load %arg1[%c0, %c0_0] : memref<12x32xbf16, #tpu.memory_space<vmem>>, vector<12x32xbf16>
    %c0_1 = arith.constant 0 : index
    %c0_2 = arith.constant 0 : index
    %1 = vector.load %arg2[%c0_1, %c0_2] : memref<32x256xbf16, #tpu.memory_space<vmem>>, vector<32x256xbf16>
    %cst = arith.constant dense<0.000000e+00> : vector<12x256xf32>
    %2 = tpu.matmul %0, %1, %cst {dimension_numbers = #tpu.dot_dimension_numbers<[1], [0], [0], [1], [0, 0, 1, 1], [], []>} : vector<12x32xbf16>, vector<32x256xbf16>, vector<12x256xf32> -> vector<12x256xf32>
    %c0_3 = arith.constant 0 : index
    %c0_4 = arith.constant 0 : index
    %3 = vector.load %arg3[%c0_3, %c0_4] : memref<1x256xf32, #tpu.memory_space<vmem>>, vector<1x256xf32>
    %4 = vector.broadcast %3 : vector<1x256xf32> to vector<12x256xf32>
    %5 = arith.addf %2, %4 : vector<12x256xf32>
    %6 = vector.extract_strided_slice %5 {offsets = [0, 0], sizes = [12, 128], strides = [1, 1]} : vector<12x256xf32> to vector<12x128xf32>
    %7 = vector.extract_strided_slice %5 {offsets = [0, 128], sizes = [12, 128], strides = [1, 1]} : vector<12x256xf32> to vector<12x128xf32>
    %cst_5 = arith.constant 0.000000e+00 : f32
    %8 = vector.broadcast %cst_5 : f32 to vector<12x128xf32>
    %9 = arith.maximumf %7, %8 : vector<12x128xf32>
    %10 = arith.truncf %9 : vector<12x128xf32> to vector<12x128xbf16>
    %c0_6 = arith.constant 0 : index
    %c0_7 = arith.constant 0 : index
    %11 = vector.load %arg4[%c0_6, %c0_7] : memref<128x128xbf16, #tpu.memory_space<vmem>>, vector<128x128xbf16>
    %cst_8 = arith.constant dense<0.000000e+00> : vector<12x128xf32>
    %12 = tpu.matmul %10, %11, %cst_8 {dimension_numbers = #tpu.dot_dimension_numbers<[1], [0], [0], [1], [0, 0, 1, 1], [], []>} : vector<12x128xbf16>, vector<128x128xbf16>, vector<12x128xf32> -> vector<12x128xf32>
    %c0_9 = arith.constant 0 : index
    %c0_10 = arith.constant 0 : index
    %13 = vector.load %arg5[%c0_9, %c0_10] : memref<1x128xf32, #tpu.memory_space<vmem>>, vector<1x128xf32>
    %14 = vector.broadcast %13 : vector<1x128xf32> to vector<12x128xf32>
    %15 = arith.addf %12, %14 : vector<12x128xf32>
    %16 = arith.addf %15, %6 : vector<12x128xf32>
    %cst_11 = arith.constant dense<0.000000e+00> : vector<12xf32>
    %17 = vector.multi_reduction <add>, %16, %cst_11 [1] : vector<12x128xf32> to vector<12xf32>
    %18 = vector.shape_cast %17 : vector<12xf32> to vector<12x1xf32>
    %cst_12 = arith.constant 1.280000e+02 : f32
    %19 = vector.broadcast %cst_12 : f32 to vector<12x1xf32>
    %20 = arith.divf %18, %19 : vector<12x1xf32>
    %21 = vector.broadcast %20 : vector<12x1xf32> to vector<12x128xf32>
    %22 = arith.subf %16, %21 : vector<12x128xf32>
    %23 = arith.mulf %22, %22 : vector<12x128xf32>
    %cst_13 = arith.constant dense<0.000000e+00> : vector<12xf32>
    %24 = vector.multi_reduction <add>, %23, %cst_13 [1] : vector<12x128xf32> to vector<12xf32>
    %25 = vector.shape_cast %24 : vector<12xf32> to vector<12x1xf32>
    %cst_14 = arith.constant 1.280000e+02 : f32
    %26 = vector.broadcast %cst_14 : f32 to vector<12x1xf32>
    %27 = arith.divf %25, %26 : vector<12x1xf32>
    %cst_15 = arith.constant 9.99999974E-6 : f32
    %28 = vector.broadcast %cst_15 : f32 to vector<12x1xf32>
    %29 = arith.addf %27, %28 : vector<12x1xf32>
    %30 = math.rsqrt %29 : vector<12x1xf32>
    %31 = vector.broadcast %30 : vector<12x1xf32> to vector<12x128xf32>
    %32 = arith.mulf %22, %31 : vector<12x128xf32>
    %c0_16 = arith.constant 0 : index
    %c0_17 = arith.constant 0 : index
    %33 = vector.load %arg6[%c0_16, %c0_17] : memref<1x128xf32, #tpu.memory_space<vmem>>, vector<1x128xf32>
    %34 = vector.broadcast %33 : vector<1x128xf32> to vector<12x128xf32>
    %35 = arith.mulf %32, %34 : vector<12x128xf32>
    %c0_18 = arith.constant 0 : index
    %c0_19 = arith.constant 0 : index
    %36 = vector.load %arg7[%c0_18, %c0_19] : memref<1x128xf32, #tpu.memory_space<vmem>>, vector<1x128xf32>
    %37 = vector.broadcast %36 : vector<1x128xf32> to vector<12x128xf32>
    %38 = arith.addf %35, %37 : vector<12x128xf32>
    %c0_20 = arith.constant 0 : index
    %c0_21 = arith.constant 0 : index
    %39 = vector.load %arg8[%c0_20, %c0_21] : memref<12x128xf32, #tpu.memory_space<vmem>>, vector<12x128xf32>
    tpu.vector_store %arg8[%c0_20, %c0_21], %38 {strides = array<i32>} : memref<12x128xf32, #tpu.memory_space<vmem>>, vector<12x128xf32>,
    return
  }
  func.func @transform_0(%arg0: i32) -> (i32, i32) {
    %c0_i32 = arith.constant 0 : i32
    %c0_i32_0 = arith.constant 0 : i32
    return %arg0, %c0_i32 : i32, i32
  }
  func.func @transform_1(%arg0: i32) -> (i32, i32) {
    %c0_i32 = arith.constant 0 : i32
    %c0_i32_0 = arith.constant 0 : i32
    %c0_i32_1 = arith.constant 0 : i32
    return %c0_i32, %c0_i32_0 : i32, i32
  }
  func.func @transform_2(%arg0: i32) -> (i32, i32) {
    %c0_i32 = arith.constant 0 : i32
    %c0_i32_0 = arith.constant 0 : i32
    %c0_i32_1 = arith.constant 0 : i32
    return %c0_i32, %c0_i32_0 : i32, i32
  }
  func.func @transform_3(%arg0: i32) -> (i32, i32) {
    %c0_i32 = arith.constant 0 : i32
    %c0_i32_0 = arith.constant 0 : i32
    %c0_i32_1 = arith.constant 0 : i32
    return %c0_i32, %c0_i32_0 : i32, i32
  }
  func.func @transform_4(%arg0: i32) -> (i32, i32) {
    %c0_i32 = arith.constant 0 : i32
    %c0_i32_0 = arith.constant 0 : i32
    %c0_i32_1 = arith.constant 0 : i32
    return %c0_i32, %c0_i32_0 : i32, i32
  }
  func.func @transform_5(%arg0: i32) -> (i32, i32) {
    %c0_i32 = arith.constant 0 : i32
    %c0_i32_0 = arith.constant 0 : i32
    %c0_i32_1 = arith.constant 0 : i32
    return %c0_i32, %c0_i32_0 : i32, i32
  }
  func.func @transform_6(%arg0: i32) -> (i32, i32) {
    %c0_i32 = arith.constant 0 : i32
    %c0_i32_0 = arith.constant 0 : i32
    %c0_i32_1 = arith.constant 0 : i32
    return %c0_i32, %c0_i32_0 : i32, i32
  }
  func.func @transform_7(%arg0: i32) -> (i32, i32) {
    %c0_i32 = arith.constant 0 : i32
    %c0_i32_0 = arith.constant 0 : i32
    return %arg0, %c0_i32 : i32, i32
  }
}

</mosaic_0001>

<bundles_post_ra>
// kernel: tpu_custom_call.1
= control target key start
LH: loop header
LB: loop body
LE: loop exit
PB: predicated region body
PF: predicated region fallthrough
CT: control target
= control target key end

     0   :  { %12 = vsyncpa [#allocation3], 0  ;;  %s585_s0 = inlined_call_operand.hbm [shape: bf16[12,32], index: 0, kind: input, shape index: {}]   ;;  %s586_s1 = inlined_call_operand.hbm [shape: bf16[32,256], index: 1, kind: input, shape index: {}]   ;;  %s587_s2 = inlined_call_operand.vmem [shape: f32[1,256], index: 2, kind: input, shape index: {}]   ;;  %s588_s3 = inlined_call_operand.hbm [shape: bf16[128,128], index: 3, kind: input, shape index: {}]   ;;  %s589_s4 = inlined_call_operand.vmem [shape: f32[1,128], index: 4, kind: input, shape index: {}]   ;;  %s590_s5 = inlined_call_operand.vmem [shape: f32[1,128], index: 5, kind: input, shape index: {}]   ;;  %s591_s6 = inlined_call_operand.vmem [shape: f32[1,128], index: 6, kind: input, shape index: {}]   ;;  %s592_s7 = inlined_call_operand.hbm [shape: f32[12,128], index: 7, kind: output, shape index: {}]  }
   0x1   :  { %13 = vsyncpa [#allocation6], 0 }
   0x2   :  { %14 = vsyncpa [#allocation4], 0  ;;  %s502_s24 = smov [#allocation5]  }
   0x3   :  { %s32_s25 = sshll.u32 %s502_s24, 4  ;;  %s33_s25 = int_to_ptr.vmem [resolvable:$true] %s32_s25 }
   0x4   :  { %s424_s26 = scalar_lea.vmem %s33_s25, 512  ;;  %p429_p1 = scmp.lt.s32.totalorder %s33_s25, %s33_s25 }
   0x5   :  { %p425_p0 = scmp.ne.s32.totalorder %s33_s25, %s424_s26  ;;  %p430_p2 = scmp.lt.s32.totalorder %s424_s26, %s424_s26 }
   0x7   :  { %p431_p3 = por %p430_p2, %p429_p1 }
   0x9   :  { %p432_p4 = pnand %p431_p3, %p425_p0 }
   0xb   :  { %435 = shalt.err (!%p432_p4)
}
   0xc   :  { %s503_s27 = smov 128   ;;  %s504_s28 = smov 8  }
   0xd   :  { %38 = dma.hbm_to_vmem [thread:$0]  %s586_s1, 512, %s33_s25, [#allocation6], %s503_s27, %s503_s27, %s504_s28  }
   0xe   :  { %s505_s8 = smov [#allocation2]  }
   0xf   :  { %s20_s9 = sshll.u32 %s505_s8, 4  ;;  %s21_s9 = int_to_ptr.vmem [resolvable:$true] %s20_s9 }
  0x10   :  { %s444_s10 = scalar_lea.vmem %s21_s9, 128  ;;  %p449_p6 = scmp.lt.s32.totalorder %s21_s9, %s21_s9 }
  0x11   :  { %p445_p5 = scmp.ne.s32.totalorder %s21_s9, %s444_s10  ;;  %p450_p7 = scmp.lt.s32.totalorder %s444_s10, %s444_s10 }
  0x13   :  { %p451_p8 = por %p450_p7, %p449_p6 }
  0x15   :  { %p452_p9 = pnand %p451_p8, %p445_p5 }
  0x17   :  { %455 = shalt.err (!%p452_p9)
}
  0x18   :  { %s506_s11 = smov 64   ;;  %s507_s12 = smov 4  }
  0x19   :  { %26 = dma.hbm_to_vmem [thread:$0]  %s585_s0, 128, %s21_s9, [#allocation3], %s506_s11, %s506_s11, %s507_s12  }
  0x1a   :  { %s508_s15 = smov [#allocation7]  }
  0x1b   :  { %s46_s16 = sshll.u32 %s508_s15, 4  ;;  %s47_s16 = int_to_ptr.vmem [resolvable:$true] %s46_s16 }
  0x1c   :  { %s464_s1 = scalar_lea.vmem %s47_s16, 1024  ;;  %p469_p11 = scmp.lt.s32.totalorder %s47_s16, %s47_s16 }
  0x1d   :  { %p465_p10 = scmp.ne.s32.totalorder %s47_s16, %s464_s1  ;;  %p470_p12 = scmp.lt.s32.totalorder %s464_s1, %s464_s1 }
  0x1f   :  { %p471_p13 = por %p470_p12, %p469_p11 }
  0x21   :  { %p472_p0 = pnand %p471_p13, %p465_p10 }
  0x23   :  { %475 = shalt.err (!%p472_p0)
}
  0x24   :  { %52 = dma.hbm_to_vmem [thread:$0]  %s588_s3, 1024, %s47_s16, [#allocation6], %s506_s11, %s506_s11, %s507_s12  }
  0x25   :  { %496 = dma.done.wait [#allocation3], 128  }
  0x26   :  { %497 = vsyncadd [#allocation3], 4294967168 }
  0x27   :  { %498 = dma.done.wait [#allocation6], 1536  }
  0x28   :  { %499 = vsyncadd [#allocation6], 4294965760  ;;  %v509_v0 = vmov 0   ;;  %v510_v1 = vmov 0.0   ;;  %v397_v2 = vld [vmem:[#allocation5 + $0x14] ss:$8 sps:$4 sm:$0xff]   ;;  %v77_v15 = vlaneseq }
  0x29   :  { %148 = vmatprep.mubr.bf16.mxu0 %v509_v0  ;;  %366 = vmatprep.subr.bf16.mxu1 %v510_v1  ;;  %v399_v3 = vld [vmem:[#allocation5 + $0x10] ss:$8 sps:$4 sm:$0xff]   ;;  %v400_v4 = vld [vmem:[#allocation5 + $0x4] ss:$8 sps:$4 sm:$0xff]   ;;  %v402_v5 = vld [vmem:[#allocation5] ss:$8 sps:$4 sm:$0xff]  }
  0x2a   :  { %128 = vmatprep.subr.bf16.mxu0 %v397_v2  ;;  %v404_v6 = vld [vmem:[#allocation7 + $0x38] sm:$0xff]   ;;  %v405_v8 = vld [vmem:[#allocation7 + $0x30] sm:$0xff]   ;;  %vm112_vm0 = vcmask 261120   ;;  %v406_v9 = vld [vmem:[#allocation7 + $0x28] sm:$0xff]   ;;  %vm511_vm1 = vmmov 0   ;;  %v78_v16 = vshrl.u32 %v77_v15, 7 }
  0x2b   :  { %129 = vmatpush1.bf16.msra.mxu0 %v399_v3  ;;  %v403_v7 = vld [vmem:[#allocation2] sm:$0x3f]   ;;  %367 = vmatpush3.bf16.msra.mxu1 %v404_v6  ;;  %v407_v10 = vld [vmem:[#allocation7 + $0x20] sm:$0xff]   ;;  %v409_v12 = vld [vmem:[#allocation7 + $0x10] sm:$0xff]   ;;  %vm278_vm2 = vcmask 1043456   ;;  %s512_s23 = smov [#allocation8]  }
  0x2c   :  { %130 = vmatprep.subr.bf16.mxu0 %v400_v4  ;;  %368 = vmatprep.subr.bf16.mxu1 %v510_v1  ;;  %v408_v11 = vld [vmem:[#allocation7 + $0x18] sm:$0xff]   ;;  %v410_v13 = vld [vmem:[#allocation7 + $0x8] sm:$0xff]   ;;  %v411_v14 = vld [vmem:[#allocation7] sm:$0xff]   ;;  %v83_v17 = vsub.s32 1, %v78_v16  ;;  %v79_v29 = vsub.s32 0, %v78_v16  ;;  %s327_s24 = sshll.u32 %s512_s23, 4  ;;  %s328_s24 = int_to_ptr.vmem [resolvable:$true] %s327_s24 }
  0x2d   :  { %382 = vmatprep.mubr.msk.bf16.mxu1 %vm511_vm1, %v510_v1  ;;  %v75_v18 = vld [vmem:[%s587_s2] sm:$0x3]  ;;  %s476_s25 = scalar_lea.vmem %s328_s24, 256  ;;  %p481_p2 = scmp.lt.s32.totalorder %s328_s24, %s328_s24 }
  0x2e   :  { %v84_v20 = vrot.slane %v75_v18, %v83_v17  ;;  %v80_v32 = vrot.slane %v75_v18, %v79_v29  ;;  %v346_v33 = vld [vmem:[%s589_s4] ss:$0 sm:$0xff]  ;;  %p477_p1 = scmp.ne.s32.totalorder %s328_s24, %s476_s25  ;;  %p482_p3 = scmp.lt.s32.totalorder %s476_s25, %s476_s25 }
  0x2f   :  { %131 = vmatpush1.bf16.msra.mxu0 %v402_v5  ;;  %369 = vmatpush3.bf16.msra.mxu1 %v405_v8  ;;  %v355_v59 = vld [vmem:[%s590_s5] ss:$0 sm:$0xff] }
  0x30   :  { %370 = vmatprep.subr.bf16.mxu1 %v510_v1  ;;  %v356_v61 = vld [vmem:[%s591_s6] ss:$0 sm:$0xff]  ;;  %p483_p4 = por %p482_p3, %p481_p2 }
  0x32   :  { %345 = vmatmul.mubr.msk.bf16.vlgmr.msra.gmra.mxu0 %vm112_vm0, %v403_v7  ;;  %p484_p5 = pnand %p483_p4, %p477_p1 }
  0x33   :  { %371 = vmatpush3.bf16.msra.mxu1 %v406_v9 }
  0x34   :  { %372 = vmatprep.subr.bf16.mxu1 %v510_v1 }
  0x37   :  { %373 = vmatpush3.bf16.msra.mxu1 %v407_v10 }
  0x38   :  { %374 = vmatprep.subr.bf16.mxu1 %v510_v1 }
  0x3b   :  { %375 = vmatpush3.bf16.msra.mxu1 %v408_v11 }
  0x3c   :  { %376 = vmatprep.subr.bf16.mxu1 %v510_v1 }
  0x3f   :  { %377 = vmatpush3.bf16.msra.mxu1 %v409_v12 }
  0x40   :  { %378 = vmatprep.subr.bf16.mxu1 %v510_v1 }
  0x43   :  { %379 = vmatpush3.bf16.msra.mxu1 %v410_v13 }
  0x44   :  { %380 = vmatprep.subr.bf16.mxu1 %v510_v1 }
  0x47   :  { %381 = vmatpush3.bf16.msra.mxu1 %v411_v14 }
  0xf2   :  { %v150_v19 = vpop.f32.mrf.mxu0 }
  0xf3   :  { %v151_v41 = vadd.f32 %v150_v19, %v80_v32 }
  0xf4   :  { %v152_v21 = vpop.f32.mrf.mxu0 }
  0xf5   :  { %v153_v23 = vadd.f32 %v152_v21, %v84_v20 }
  0xf6   :  { %v154_v22 = vpop.f32.mrf.mxu0 }
  0xf7   :  { %v159_v26 = vmax.f32 %v153_v23, 0.0  ;;  %v155_v35 = vadd.f32 %v154_v22, %v80_v32 }
  0xf8   :  { %v156_v24 = vpop.f32.mrf.mxu0 }
  0xf9   :  { %v157_v25 = vadd.f32 %v156_v24, %v84_v20 }
  0xfb   :  { %v160_v27 = vmax.f32 %v157_v25, 0.0 }
  0xfd   :  { %v161_v28 = vpack.c.bf16 %v160_v27, %v159_v26 }
  0xff   :  { %383 = vmatmul.mubr.bf16.vlgmr.msra.gmra.mxu1 %v161_v28 }
 0x1bf   :  { %v267_v30 = vpop.f32.mrf.mxu1 }
 0x1c0   :  { %v268_v39 = vadd.f32 %v346_v33, %v267_v30 }
 0x1c1   :  { %v384_v31 = vpop.f32.mrf.mxu1 }
 0x1c2   :  { %v274_v42 = vadd.f32 %v268_v39, %v151_v41 }
 0x1c3   :  { %v270_v34 = vpop.f32.mrf.mxu1 }
 0x1c4   :  { %v271_v36 = vadd.f32 %v346_v33, %v270_v34 }
 0x1c5   :  { %v385_v37 = vpop.f32.mrf.mxu1 }
 0x1c6   :  { %v275_v38 = vadd.f32 %v271_v36, %v155_v35 }
 0x1c8   :  { %v279_v40 = vsel %vm278_vm2, %v275_v38, 0.0 }
 0x1c9   :  { %280 = vadd.xlane.f32.xlu0 %v279_v40 }
 0x1cd   :  { %276 = vadd.xlane.f32.xlu0 %v274_v42 }
 0x252   :  { %v281_v43 = vpop.xlane.xlu0 %280 }
 0x253   :  { %v284_v44 = vmul.f32 0.0078125, %v281_v43 }
 0x255   :  { %v286_v47 = vsub.f32 %v275_v38, %v284_v44 }
 0x256   :  { %v277_v45 = vpop.xlane.xlu0 %276 }
 0x257   :  { %v283_v46 = vmul.f32 0.0078125, %v277_v45  ;;  %v288_v50 = vmul.f32 %v286_v47, %v286_v47 }
 0x259   :  { %v285_v48 = vsub.f32 %v274_v42, %v283_v46  ;;  %v291_v51 = vsel %vm278_vm2, %v288_v50, 0.0 }
 0x25b   :  { %v287_v49 = vmul.f32 %v285_v48, %v285_v48 }
 0x25d   :  { %289 = vadd.xlane.f32.xlu1 %v287_v49 }
 0x261   :  { %292 = vadd.xlane.f32.xlu1 %v291_v51 }
 0x2e6   :  { %v290_v52 = vpop.xlane.xlu1 %289 }
 0x2e7   :  { %v294_v53 = vmul.f32 0.0078125, %v290_v52 }
 0x2e9   :  { %v296_v54 = vadd.f32 1e-05, %v294_v53 }
 0x2ea   :  { %v293_v55 = vpop.xlane.xlu1 %292 }
 0x2eb   :  { %412 = vrsqrt.f32 %v296_v54  ;;  %v295_v56 = vmul.f32 0.0078125, %v293_v55 }
 0x2ed   :  { %v297_v57 = vadd.f32 1e-05, %v295_v56 }
 0x2ef   :  { %414 = vrsqrt.f32 %v297_v57 }
 0x2f8   :  { %v413_v58 = vpop.eup %412 }
 0x2f9   :  { %v300_v60 = vmul.f32 %v413_v58, %v285_v48 }
 0x2fb   :  { %v309_v62 = vmul.f32 %v355_v59, %v300_v60 }
 0x2fc   :  { %v415_v63 = vpop.eup %414 }
 0x2fd   :  { %v301_v0 = vmul.f32 %v415_v63, %v286_v47  ;;  %v318_v1 = vadd.f32 %v356_v61, %v309_v62 }
 0x2ff   :  { %v310_v2 = vmul.f32 %v355_v59, %v301_v0  ;;  %320 = vst [vmem:[#allocation8] sm:$0xff] %v318_v1 }
 0x301   :  { %v319_v3 = vadd.f32 %v356_v61, %v310_v2 }
 0x303   :  { %321 = vst [vmem:[#allocation8 + $0x8] sm:$0xf] %v319_v3 }
 0x304   :  { %487 = shalt.err (!%p484_p5)
}
 0x305   :  { %333 = dma.vmem_to_hbm [thread:$0]  %s328_s24, 256, %s592_s7, [#allocation4], %s503_s27, %s503_s27, %s504_s28  }
 0x306   :  { %500 = dma.done.wait [#allocation4], 256  }
 0x307   :  { %501 = vsyncadd [#allocation4], 4294967040 }
 0x308   :  { %337 = vsyncpa [#allocation3], 1 }
 0x309   :  { %338 = vsyncpa [#allocation6], 1 }
 0x30a   :  { %339 = vsyncpa [#allocation4], 1 }

// kernel: tpu_custom_call.1
= control target key start
LH: loop header
LB: loop body
LE: loop exit
PB: predicated region body
PF: predicated region fallthrough
CT: control target
= control target key end

     0   :  { %12 = vsyncpa [#allocation3], 0  ;;  %s585_s0 = inlined_call_operand.hbm [shape: bf16[12,32], index: 0, kind: input, shape index: {}]   ;;  %s586_s1 = inlined_call_operand.hbm [shape: bf16[32,256], index: 1, kind: input, shape index: {}]   ;;  %s587_s2 = inlined_call_operand.vmem [shape: f32[1,256], index: 2, kind: input, shape index: {}]   ;;  %s588_s3 = inlined_call_operand.hbm [shape: bf16[128,128], index: 3, kind: input, shape index: {}]   ;;  %s589_s4 = inlined_call_operand.vmem [shape: f32[1,128], index: 4, kind: input, shape index: {}]   ;;  %s590_s5 = inlined_call_operand.vmem [shape: f32[1,128], index: 5, kind: input, shape index: {}]   ;;  %s591_s6 = inlined_call_operand.vmem [shape: f32[1,128], index: 6, kind: input, shape index: {}]   ;;  %s592_s7 = inlined_call_operand.hbm [shape: f32[12,128], index: 7, kind: output, shape index: {}]  }
   0x1   :  { %13 = vsyncpa [#allocation6], 0 }
   0x2   :  { %14 = vsyncpa [#allocation4], 0  ;;  %s502_s24 = smov [#allocation5]  }
   0x3   :  { %s32_s25 = sshll.u32 %s502_s24, 4  ;;  %s33_s25 = int_to_ptr.vmem [resolvable:$true] %s32_s25 }
   0x4   :  { %s424_s26 = scalar_lea.vmem %s33_s25, 512  ;;  %p429_p1 = scmp.lt.s32.totalorder %s33_s25, %s33_s25 }
   0x5   :  { %p425_p0 = scmp.ne.s32.totalorder %s33_s25, %s424_s26  ;;  %p430_p2 = scmp.lt.s32.totalorder %s424_s26, %s424_s26 }
   0x7   :  { %p431_p3 = por %p430_p2, %p429_p1 }
   0x9   :  { %p432_p4 = pnand %p431_p3, %p425_p0 }
   0xb   :  { %435 = shalt.err (!%p432_p4)
}
   0xc   :  { %s503_s27 = smov 128   ;;  %s504_s28 = smov 8  }
   0xd   :  { %38 = dma.hbm_to_vmem [thread:$0]  %s586_s1, 512, %s33_s25, [#allocation6], %s503_s27, %s503_s27, %s504_s28  }
   0xe   :  { %s505_s8 = smov [#allocation2]  }
   0xf   :  { %s20_s9 = sshll.u32 %s505_s8, 4  ;;  %s21_s9 = int_to_ptr.vmem [resolvable:$true] %s20_s9 }
  0x10   :  { %s444_s10 = scalar_lea.vmem %s21_s9, 128  ;;  %p449_p6 = scmp.lt.s32.totalorder %s21_s9, %s21_s9 }
  0x11   :  { %p445_p5 = scmp.ne.s32.totalorder %s21_s9, %s444_s10  ;;  %p450_p7 = scmp.lt.s32.totalorder %s444_s10, %s444_s10 }
  0x13   :  { %p451_p8 = por %p450_p7, %p449_p6 }
  0x15   :  { %p452_p9 = pnand %p451_p8, %p445_p5 }
  0x17   :  { %455 = shalt.err (!%p452_p9)
}
  0x18   :  { %s506_s11 = smov 64   ;;  %s507_s12 = smov 4  }
  0x19   :  { %26 = dma.hbm_to_vmem [thread:$0]  %s585_s0, 128, %s21_s9, [#allocation3], %s506_s11, %s506_s11, %s507_s12  }
  0x1a   :  { %s508_s15 = smov [#allocation7]  }
  0x1b   :  { %s46_s16 = sshll.u32 %s508_s15, 4  ;;  %s47_s16 = int_to_ptr.vmem [resolvable:$true] %s46_s16 }
  0x1c   :  { %s464_s1 = scalar_lea.vmem %s47_s16, 1024  ;;  %p469_p11 = scmp.lt.s32.totalorder %s47_s16, %s47_s16 }
  0x1d   :  { %p465_p10 = scmp.ne.s32.totalorder %s47_s16, %s464_s1  ;;  %p470_p12 = scmp.lt.s32.totalorder %s464_s1, %s464_s1 }
  0x1f   :  { %p471_p13 = por %p470_p12, %p469_p11 }
  0x21   :  { %p472_p0 = pnand %p471_p13, %p465_p10 }
  0x23   :  { %475 = shalt.err (!%p472_p0)
}
  0x24   :  { %52 = dma.hbm_to_vmem [thread:$0]  %s588_s3, 1024, %s47_s16, [#allocation6], %s506_s11, %s506_s11, %s507_s12  }
  0x25   :  { %496 = dma.done.wait [#allocation3], 128  }
  0x26   :  { %497 = vsyncadd [#allocation3], 4294967168 }
  0x27   :  { %498 = dma.done.wait [#allocation6], 1536  }
  0x28   :  { %499 = vsyncadd [#allocation6], 4294965760  ;;  %v509_v0 = vmov 0   ;;  %v510_v1 = vmov 0.0   ;;  %v397_v2 = vld [vmem:[#allocation5 + $0x14] ss:$8 sps:$4 sm:$0xff]   ;;  %v77_v15 = vlaneseq }
  0x29   :  { %148 = vmatprep.mubr.bf16.mxu0 %v509_v0  ;;  %366 = vmatprep.subr.bf16.mxu1 %v510_v1  ;;  %v399_v3 = vld [vmem:[#allocation5 + $0x10] ss:$8 sps:$4 sm:$0xff]   ;;  %v400_v4 = vld [vmem:[#allocation5 + $0x4] ss:$8 sps:$4 sm:$0xff]   ;;  %v402_v5 = vld [vmem:[#allocation5] ss:$8 sps:$4 sm:$0xff]  }
  0x2a   :  { %128 = vmatprep.subr.bf16.mxu0 %v397_v2  ;;  %v404_v6 = vld [vmem:[#allocation7 + $0x38] sm:$0xff]   ;;  %v405_v8 = vld [vmem:[#allocation7 + $0x30] sm:$0xff]   ;;  %vm112_vm0 = vcmask 261120   ;;  %v406_v9 = vld [vmem:[#allocation7 + $0x28] sm:$0xff]   ;;  %vm511_vm1 = vmmov 0   ;;  %v78_v16 = vshrl.u32 %v77_v15, 7 }
  0x2b   :  { %129 = vmatpush1.bf16.msra.mxu0 %v399_v3  ;;  %v403_v7 = vld [vmem:[#allocation2] sm:$0x3f]   ;;  %367 = vmatpush3.bf16.msra.mxu1 %v404_v6  ;;  %v407_v10 = vld [vmem:[#allocation7 + $0x20] sm:$0xff]   ;;  %v409_v12 = vld [vmem:[#allocation7 + $0x10] sm:$0xff]   ;;  %vm278_vm2 = vcmask 1043456   ;;  %s512_s23 = smov [#allocation8]  }
  0x2c   :  { %130 = vmatprep.subr.bf16.mxu0 %v400_v4  ;;  %368 = vmatprep.subr.bf16.mxu1 %v510_v1  ;;  %v408_v11 = vld [vmem:[#allocation7 + $0x18] sm:$0xff]   ;;  %v410_v13 = vld [vmem:[#allocation7 + $0x8] sm:$0xff]   ;;  %v411_v14 = vld [vmem:[#allocation7] sm:$0xff]   ;;  %v83_v17 = vsub.s32 1, %v78_v16  ;;  %v79_v29 = vsub.s32 0, %v78_v16  ;;  %s327_s24 = sshll.u32 %s512_s23, 4  ;;  %s328_s24 = int_to_ptr.vmem [resolvable:$true] %s327_s24 }
  0x2d   :  { %382 = vmatprep.mubr.msk.bf16.mxu1 %vm511_vm1, %v510_v1  ;;  %v75_v18 = vld [vmem:[%s587_s2] sm:$0x3]  ;;  %s476_s25 = scalar_lea.vmem %s328_s24, 256  ;;  %p481_p2 = scmp.lt.s32.totalorder %s328_s24, %s328_s24 }
  0x2e   :  { %v84_v20 = vrot.slane %v75_v18, %v83_v17  ;;  %v80_v32 = vrot.slane %v75_v18, %v79_v29  ;;  %v346_v33 = vld [vmem:[%s589_s4] ss:$0 sm:$0xff]  ;;  %p477_p1 = scmp.ne.s32.totalorder %s328_s24, %s476_s25  ;;  %p482_p3 = scmp.lt.s32.totalorder %s476_s25, %s476_s25 }
  0x2f   :  { %131 = vmatpush1.bf16.msra.mxu0 %v402_v5  ;;  %369 = vmatpush3.bf16.msra.mxu1 %v405_v8  ;;  %v355_v59 = vld [vmem:[%s590_s5] ss:$0 sm:$0xff] }
  0x30   :  { %370 = vmatprep.subr.bf16.mxu1 %v510_v1  ;;  %v356_v61 = vld [vmem:[%s591_s6] ss:$0 sm:$0xff]  ;;  %p483_p4 = por %p482_p3, %p481_p2 }
  0x32   :  { %345 = vmatmul.mubr.msk.bf16.vlgmr.msra.gmra.mxu0 %vm112_vm0, %v403_v7  ;;  %p484_p5 = pnand %p483_p4, %p477_p1 }
  0x33   :  { %371 = vmatpush3.bf16.msra.mxu1 %v406_v9 }
  0x34   :  { %372 = vmatprep.subr.bf16.mxu1 %v510_v1 }
  0x37   :  { %373 = vmatpush3.bf16.msra.mxu1 %v407_v10 }
  0x38   :  { %374 = vmatprep.subr.bf16.mxu1 %v510_v1 }
  0x3b   :  { %375 = vmatpush3.bf16.msra.mxu1 %v408_v11 }
  0x3c   :  { %376 = vmatprep.subr.bf16.mxu1 %v510_v1 }
  0x3f   :  { %377 = vmatpush3.bf16.msra.mxu1 %v409_v12 }
  0x40   :  { %378 = vmatprep.subr.bf16.mxu1 %v510_v1 }
  0x43   :  { %379 = vmatpush3.bf16.msra.mxu1 %v410_v13 }
  0x44   :  { %380 = vmatprep.subr.bf16.mxu1 %v510_v1 }
  0x47   :  { %381 = vmatpush3.bf16.msra.mxu1 %v411_v14 }
  0xf2   :  { %v150_v19 = vpop.f32.mrf.mxu0 }
  0xf3   :  { %v151_v41 = vadd.f32 %v150_v19, %v80_v32 }
  0xf4   :  { %v152_v21 = vpop.f32.mrf.mxu0 }
  0xf5   :  { %v153_v23 = vadd.f32 %v152_v21, %v84_v20 }
  0xf6   :  { %v154_v22 = vpop.f32.mrf.mxu0 }
  0xf7   :  { %v159_v26 = vmax.f32 %v153_v23, 0.0  ;;  %v155_v35 = vadd.f32 %v154_v22, %v80_v32 }
  0xf8   :  { %v156_v24 = vpop.f32.mrf.mxu0 }
  0xf9   :  { %v157_v25 = vadd.f32 %v156_v24, %v84_v20 }
  0xfb   :  { %v160_v27 = vmax.f32 %v157_v25, 0.0 }
  0xfd   :  { %v161_v28 = vpack.c.bf16 %v160_v27, %v159_v26 }
  0xff   :  { %383 = vmatmul.mubr.bf16.vlgmr.msra.gmra.mxu1 %v161_v28 }
 0x1bf   :  { %v267_v30 = vpop.f32.mrf.mxu1 }
 0x1c0   :  { %v268_v39 = vadd.f32 %v346_v33, %v267_v30 }
 0x1c1   :  { %v384_v31 = vpop.f32.mrf.mxu1 }
 0x1c2   :  { %v274_v42 = vadd.f32 %v268_v39, %v151_v41 }
 0x1c3   :  { %v270_v34 = vpop.f32.mrf.mxu1 }
 0x1c4   :  { %v271_v36 = vadd.f32 %v346_v33, %v270_v34 }
 0x1c5   :  { %v385_v37 = vpop.f32.mrf.mxu1 }
 0x1c6   :  { %v275_v38 = vadd.f32 %v271_v36, %v155_v35 }
 0x1c8   :  { %v279_v40 = vsel %vm278_vm2, %v275_v38, 0.0 }
 0x1c9   :  { %280 = vadd.xlane.f32.xlu0 %v279_v40 }
 0x1cd   :  { %276 = vadd.xlane.f32.xlu0 %v274_v42 }
 0x252   :  { %v281_v43 = vpop.xlane.xlu0 %280 }
 0x253   :  { %v284_v44 = vmul.f32 0.0078125, %v281_v43 }
 0x255   :  { %v286_v47 = vsub.f32 %v275_v38, %v284_v44 }
 0x256   :  { %v277_v45 = vpop.xlane.xlu0 %276 }
 0x257   :  { %v283_v46 = vmul.f32 0.0078125, %v277_v45  ;;  %v288_v50 = vmul.f32 %v286_v47, %v286_v47 }
 0x259   :  { %v285_v48 = vsub.f32 %v274_v42, %v283_v46  ;;  %v291_v51 = vsel %vm278_vm2, %v288_v50, 0.0 }
 0x25b   :  { %v287_v49 = vmul.f32 %v285_v48, %v285_v48 }
 0x25d   :  { %289 = vadd.xlane.f32.xlu1 %v287_v49 }
 0x261   :  { %292 = vadd.xlane.f32.xlu1 %v291_v51 }
 0x2e6   :  { %v290_v52 = vpop.xlane.xlu1 %289 }
 0x2e7   :  { %v294_v53 = vmul.f32 0.0078125, %v290_v52 }
 0x2e9   :  { %v296_v54 = vadd.f32 1e-05, %v294_v53 }
 0x2ea   :  { %v293_v55 = vpop.xlane.xlu1 %292 }
 0x2eb   :  { %412 = vrsqrt.f32 %v296_v54  ;;  %v295_v56 = vmul.f32 0.0078125, %v293_v55 }
 0x2ed   :  { %v297_v57 = vadd.f32 1e-05, %v295_v56 }
 0x2ef   :  { %414 = vrsqrt.f32 %v297_v57 }
 0x2f8   :  { %v413_v58 = vpop.eup %412 }
 0x2f9   :  { %v300_v60 = vmul.f32 %v413_v58, %v285_v48 }
 0x2fb   :  { %v309_v62 = vmul.f32 %v355_v59, %v300_v60 }
 0x2fc   :  { %v415_v63 = vpop.eup %414 }
 0x2fd   :  { %v301_v0 = vmul.f32 %v415_v63, %v286_v47  ;;  %v318_v1 = vadd.f32 %v356_v61, %v309_v62 }
 0x2ff   :  { %v310_v2 = vmul.f32 %v355_v59, %v301_v0  ;;  %320 = vst [vmem:[#allocation8] sm:$0xff] %v318_v1 }
 0x301   :  { %v319_v3 = vadd.f32 %v356_v61, %v310_v2 }
 0x303   :  { %321 = vst [vmem:[#allocation8 + $0x8] sm:$0xf] %v319_v3 }
 0x304   :  { %487 = shalt.err (!%p484_p5)
}
 0x305   :  { %333 = dma.vmem_to_hbm [thread:$0]  %s328_s24, 256, %s592_s7, [#allocation4], %s503_s27, %s503_s27, %s504_s28  }
 0x306   :  { %500 = dma.done.wait [#allocation4], 256  }
 0x307   :  { %501 = vsyncadd [#allocation4], 4294967040 }
 0x308   :  { %337 = vsyncpa [#allocation3], 1 }
 0x309   :  { %338 = vsyncpa [#allocation6], 1 }
 0x30a   :  { %339 = vsyncpa [#allocation4], 1 }

</bundles_post_ra>
